<compile_context>
chip_gen: v7x
topology: tpu7x:2x2x1
jax: 0.10.0
libtpu: 0.0.40
codegen_flags: <defaults>
</compile_context>

<pallas_src>
import jax
import jax.numpy as jnp
from jax.experimental import pallas as pl
from jax.experimental.pallas import tpu as pltpu


def mlp_kernel(params_ref, x_ref, o_ref):
    # params_ref: (27,) f32 in SMEM = [W1 (3x4) | b1 (3) | W2 (3x3) | b2 (3)]
    # x_ref:      (4, tbs, 128) f32  -- batch on (sublane, lane)
    # o_ref:      (3, tbs, 128) f32
    x = [x_ref[i] for i in range(4)]          # four dense (tbs, 128) tiles

    # Layer 1: h_k = sigmoid(b1_k + sum_i W1[k,i] * x_i)   (scalar-splat FMAs)
    h = []
    for k in range(3):
        acc = x[0] * params_ref[4 * k + 0]
        for i in range(1, 4):
            acc = acc + x[i] * params_ref[4 * k + i]
        acc = acc + params_ref[12 + k]
        h.append(jax.nn.sigmoid(acc))         # EUP

    # Layer 2: y_k = b2_k + sum_j W2[k,j] * h_j
    for k in range(3):
        acc = h[0] * params_ref[15 + 3 * k + 0]
        for j in range(1, 3):
            acc = acc + h[j] * params_ref[15 + 3 * k + j]
        o_ref[k] = (acc + params_ref[24 + k]).astype(o_ref.dtype)


def mlp_forward(x, w1, b1, w2, b2, *, tbs=None):
    """x: (B, 4); w1: (3, 4); b1: (3,); w2: (3, 3); b2: (3,)  (PyTorch Linear layout)."""
    B = x.shape[0]
    n_rows = pl.cdiv(B, 128)                       # batch rows of 128 lanes
    if tbs is None:
        # Aim for >= 2 grid steps (v7x: shard across both TCs), cap the
        # per-step footprint at tbs=512 rows (~3.5 MiB double-buffered VMEM).
        tbs = min(512, max(8, 8 * pl.cdiv(pl.cdiv(n_rows, 2), 8)))
    tbs = max(8, 8 * pl.cdiv(tbs, 8))              # sublane-aligned
    tbs = min(tbs, 8 * pl.cdiv(n_rows, 8))         # don't exceed (padded) total
    grid = pl.cdiv(n_rows, tbs)
    rows_pad = grid * tbs
    b_pad = rows_pad * 128

    x32 = x.astype(jnp.float32)
    # Feature-major layout with batch packed onto (sublane, lane).
    # TODO(synk): a feature-major producer/consumer would let us drop this
    # transpose and the final one (the only remaining extra HBM passes).
    x3 = jnp.pad(x32, ((0, b_pad - B), (0, 0))).T.reshape(4, rows_pad, 128)

    # Flat parameter vector for SMEM scalar prefetch.
    params = jnp.concatenate(
        [
            w1.astype(jnp.float32).reshape(-1),    # 12
            b1.astype(jnp.float32).reshape(-1),    # 3
            w2.astype(jnp.float32).reshape(-1),    # 9
            b2.astype(jnp.float32).reshape(-1),    # 3
        ]
    )                                              # (27,)

    y3 = pl.pallas_call(
        mlp_kernel,
        out_shape=jax.ShapeDtypeStruct((3, rows_pad, 128), jnp.float32),
        grid_spec=pltpu.PrefetchScalarGridSpec(
            num_scalar_prefetch=1,
            grid=(grid,),
            in_specs=[pl.BlockSpec((4, tbs, 128), lambda i, p: (0, i, 0))],
            out_specs=pl.BlockSpec((3, tbs, 128), lambda i, p: (0, i, 0)),
        ),
        compiler_params=pltpu.CompilerParams(
            dimension_semantics=("parallel",),
        ),
    )(params, x3)

    return y3.reshape(3, b_pad)[:, :B].T           # back to (B, 3)


def reference_forward(x, w1, b1, w2, b2):
    h = jax.nn.sigmoid(x @ w1.T + b1)
    return h @ w2.T + b2


if __name__ == "__main__":
    key = jax.random.PRNGKey(0)
    kx, k1, k2, k3, k4 = jax.random.split(key, 5)

    # nn.Linear(4,3) / nn.Linear(3,3) parameter shapes (out, in).
    w1 = jax.random.normal(k1, (3, 4), dtype=jnp.float32) * 0.5
    b1 = jax.random.normal(k2, (3,), dtype=jnp.float32) * 0.1
    w2 = jax.random.normal(k3, (3, 3), dtype=jnp.float32) * 0.5
    b2 = jax.random.normal(k4, (3,), dtype=jnp.float32) * 0.1

    # Small batch (single tile).
    B = 8
    x = jax.random.normal(kx, (B, 4), dtype=jnp.float32)
    out = jax.block_until_ready(mlp_forward(x, w1, b1, w2, b2))
    ref = reference_forward(x, w1, b1, w2, b2)
    assert out.shape == (B, 3)
    assert jnp.allclose(out, ref, atol=1e-5, rtol=1e-5), "mismatch vs reference (B=8)"

    # Multi-tile grid path (grid > 1, ragged batch padded inside the wrapper).
    B2 = 2053
    x2 = jax.random.normal(kx, (B2, 4), dtype=jnp.float32)
    out2 = jax.block_until_ready(mlp_forward(x2, w1, b1, w2, b2))
    ref2 = reference_forward(x2, w1, b1, w2, b2)
    assert out2.shape == (B2, 3)
    assert jnp.allclose(out2, ref2, atol=1e-5, rtol=1e-5), "mismatch vs reference (B=2053)"

    # Explicit small tile (forces grid=3) to exercise the tiling logic.
    out3 = jax.block_until_ready(mlp_forward(x2, w1, b1, w2, b2, tbs=8))
    assert jnp.allclose(out3, ref2, atol=1e-5, rtol=1e-5), "mismatch vs reference (tbs=8)"

    print("KERNEL_OK")
</pallas_src>

<mosaic_0001>
module attributes {stable_mosaic.version = 11 : i64} {
  func.func @mlp_kernel(%arg0: i32, %arg1: memref<27xf32, #tpu.memory_space<smem>>, %arg2: memref<4x8x128xf32, #tpu.memory_space<vmem>>, %arg3: memref<3x8x128xf32, #tpu.memory_space<vmem>>) attributes {dimension_semantics = [#tpu.dimension_semantics<parallel>], iteration_bounds = array<i64: 1>, scalar_prefetch = 1 : i64, scratch_operands = 0 : i64, tpu.core_type = #tpu.core_type<tc>, window_params = [{transform_indices = @transform_0, window_bounds = array<i64: 4, 8, 128>}, {transform_indices = @transform_1, window_bounds = array<i64: 3, 8, 128>}]} {
    %c0 = arith.constant 0 : index
    %c0_0 = arith.constant 0 : index
    %c0_1 = arith.constant 0 : index
    %0 = vector.load %arg2[%c0, %c0_0, %c0_1] : memref<4x8x128xf32, #tpu.memory_space<vmem>>, vector<1x8x128xf32>
    %1 = vector.shape_cast %0 : vector<1x8x128xf32> to vector<8x128xf32>
    %c1 = arith.constant 1 : index
    %c0_2 = arith.constant 0 : index
    %c0_3 = arith.constant 0 : index
    %2 = vector.load %arg2[%c1, %c0_2, %c0_3] : memref<4x8x128xf32, #tpu.memory_space<vmem>>, vector<1x8x128xf32>
    %3 = vector.shape_cast %2 : vector<1x8x128xf32> to vector<8x128xf32>
    %c2 = arith.constant 2 : index
    %c0_4 = arith.constant 0 : index
    %c0_5 = arith.constant 0 : index
    %4 = vector.load %arg2[%c2, %c0_4, %c0_5] : memref<4x8x128xf32, #tpu.memory_space<vmem>>, vector<1x8x128xf32>
    %5 = vector.shape_cast %4 : vector<1x8x128xf32> to vector<8x128xf32>
    %c3 = arith.constant 3 : index
    %c0_6 = arith.constant 0 : index
    %c0_7 = arith.constant 0 : index
    %6 = vector.load %arg2[%c3, %c0_6, %c0_7] : memref<4x8x128xf32, #tpu.memory_space<vmem>>, vector<1x8x128xf32>
    %7 = vector.shape_cast %6 : vector<1x8x128xf32> to vector<8x128xf32>
    %c0_8 = arith.constant 0 : index
    %8 = memref.load %arg1[%c0_8] : memref<27xf32, #tpu.memory_space<smem>>
    %9 = vector.broadcast %8 : f32 to vector<8x128xf32>
    %10 = arith.mulf %1, %9 : vector<8x128xf32>
    %c1_9 = arith.constant 1 : index
    %11 = memref.load %arg1[%c1_9] : memref<27xf32, #tpu.memory_space<smem>>
    %12 = vector.broadcast %11 : f32 to vector<8x128xf32>
    %13 = arith.mulf %3, %12 : vector<8x128xf32>
    %14 = arith.addf %10, %13 : vector<8x128xf32>
    %c2_10 = arith.constant 2 : index
    %15 = memref.load %arg1[%c2_10] : memref<27xf32, #tpu.memory_space<smem>>
    %16 = vector.broadcast %15 : f32 to vector<8x128xf32>
    %17 = arith.mulf %5, %16 : vector<8x128xf32>
    %18 = arith.addf %14, %17 : vector<8x128xf32>
    %c3_11 = arith.constant 3 : index
    %19 = memref.load %arg1[%c3_11] : memref<27xf32, #tpu.memory_space<smem>>
    %20 = vector.broadcast %19 : f32 to vector<8x128xf32>
    %21 = arith.mulf %7, %20 : vector<8x128xf32>
    %22 = arith.addf %18, %21 : vector<8x128xf32>
    %c12 = arith.constant 12 : index
    %23 = memref.load %arg1[%c12] : memref<27xf32, #tpu.memory_space<smem>>
    %24 = vector.broadcast %23 : f32 to vector<8x128xf32>
    %25 = arith.addf %22, %24 : vector<8x128xf32>
    %26 = arith.negf %25 : vector<8x128xf32>
    %27 = math.exp %26 : vector<8x128xf32>
    %cst = arith.constant 1.000000e+00 : f32
    %28 = vector.broadcast %cst : f32 to vector<8x128xf32>
    %29 = arith.addf %28, %27 : vector<8x128xf32>
    %30 = arith.divf %28, %29 : vector<8x128xf32>
    %c4 = arith.constant 4 : index
    %31 = memref.load %arg1[%c4] : memref<27xf32, #tpu.memory_space<smem>>
    %32 = vector.broadcast %31 : f32 to vector<8x128xf32>
    %33 = arith.mulf %1, %32 : vector<8x128xf32>
    %c5 = arith.constant 5 : index
    %34 = memref.load %arg1[%c5] : memref<27xf32, #tpu.memory_space<smem>>
    %35 = vector.broadcast %34 : f32 to vector<8x128xf32>
    %36 = arith.mulf %3, %35 : vector<8x128xf32>
    %37 = arith.addf %33, %36 : vector<8x128xf32>
    %c6 = arith.constant 6 : index
    %38 = memref.load %arg1[%c6] : memref<27xf32, #tpu.memory_space<smem>>
    %39 = vector.broadcast %38 : f32 to vector<8x128xf32>
    %40 = arith.mulf %5, %39 : vector<8x128xf32>
    %41 = arith.addf %37, %40 : vector<8x128xf32>
    %c7 = arith.constant 7 : index
    %42 = memref.load %arg1[%c7] : memref<27xf32, #tpu.memory_space<smem>>
    %43 = vector.broadcast %42 : f32 to vector<8x128xf32>
    %44 = arith.mulf %7, %43 : vector<8x128xf32>
    %45 = arith.addf %41, %44 : vector<8x128xf32>
    %c13 = arith.constant 13 : index
    %46 = memref.load %arg1[%c13] : memref<27xf32, #tpu.memory_space<smem>>
    %47 = vector.broadcast %46 : f32 to vector<8x128xf32>
    %48 = arith.addf %45, %47 : vector<8x128xf32>
    %49 = arith.negf %48 : vector<8x128xf32>
    %50 = math.exp %49 : vector<8x128xf32>
    %cst_12 = arith.constant 1.000000e+00 : f32
    %51 = vector.broadcast %cst_12 : f32 to vector<8x128xf32>
    %52 = arith.addf %51, %50 : vector<8x128xf32>
    %53 = arith.divf %51, %52 : vector<8x128xf32>
    %c8 = arith.constant 8 : index
    %54 = memref.load %arg1[%c8] : memref<27xf32, #tpu.memory_space<smem>>
    %55 = vector.broadcast %54 : f32 to vector<8x128xf32>
    %56 = arith.mulf %1, %55 : vector<8x128xf32>
    %c9 = arith.constant 9 : index
    %57 = memref.load %arg1[%c9] : memref<27xf32, #tpu.memory_space<smem>>
    %58 = vector.broadcast %57 : f32 to vector<8x128xf32>
    %59 = arith.mulf %3, %58 : vector<8x128xf32>
    %60 = arith.addf %56, %59 : vector<8x128xf32>
    %c10 = arith.constant 10 : index
    %61 = memref.load %arg1[%c10] : memref<27xf32, #tpu.memory_space<smem>>
    %62 = vector.broadcast %61 : f32 to vector<8x128xf32>
    %63 = arith.mulf %5, %62 : vector<8x128xf32>
    %64 = arith.addf %60, %63 : vector<8x128xf32>
    %c11 = arith.constant 11 : index
    %65 = memref.load %arg1[%c11] : memref<27xf32, #tpu.memory_space<smem>>
    %66 = vector.broadcast %65 : f32 to vector<8x128xf32>
    %67 = arith.mulf %7, %66 : vector<8x128xf32>
    %68 = arith.addf %64, %67 : vector<8x128xf32>
    %c14 = arith.constant 14 : index
    %69 = memref.load %arg1[%c14] : memref<27xf32, #tpu.memory_space<smem>>
    %70 = vector.broadcast %69 : f32 to vector<8x128xf32>
    %71 = arith.addf %68, %70 : vector<8x128xf32>
    %72 = arith.negf %71 : vector<8x128xf32>
    %73 = math.exp %72 : vector<8x128xf32>
    %cst_13 = arith.constant 1.000000e+00 : f32
    %74 = vector.broadcast %cst_13 : f32 to vector<8x128xf32>
    %75 = arith.addf %74, %73 : vector<8x128xf32>
    %76 = arith.divf %74, %75 : vector<8x128xf32>
    %c15 = arith.constant 15 : index
    %77 = memref.load %arg1[%c15] : memref<27xf32, #tpu.memory_space<smem>>
    %78 = vector.broadcast %77 : f32 to vector<8x128xf32>
    %79 = arith.mulf %30, %78 : vector<8x128xf32>
    %c16 = arith.constant 16 : index
    %80 = memref.load %arg1[%c16] : memref<27xf32, #tpu.memory_space<smem>>
    %81 = vector.broadcast %80 : f32 to vector<8x128xf32>
    %82 = arith.mulf %53, %81 : vector<8x128xf32>
    %83 = arith.addf %79, %82 : vector<8x128xf32>
    %c17 = arith.constant 17 : index
    %84 = memref.load %arg1[%c17] : memref<27xf32, #tpu.memory_space<smem>>
    %85 = vector.broadcast %84 : f32 to vector<8x128xf32>
    %86 = arith.mulf %76, %85 : vector<8x128xf32>
    %87 = arith.addf %83, %86 : vector<8x128xf32>
    %c24 = arith.constant 24 : index
    %88 = memref.load %arg1[%c24] : memref<27xf32, #tpu.memory_space<smem>>
    %89 = vector.broadcast %88 : f32 to vector<8x128xf32>
    %90 = arith.addf %87, %89 : vector<8x128xf32>
    %c0_14 = arith.constant 0 : index
    %c0_15 = arith.constant 0 : index
    %c0_16 = arith.constant 0 : index
    %91 = vector.load %arg3[%c0_14, %c0_15, %c0_16] : memref<3x8x128xf32, #tpu.memory_space<vmem>>, vector<1x8x128xf32>
    %92 = vector.shape_cast %91 : vector<1x8x128xf32> to vector<8x128xf32>
    %93 = vector.shape_cast %90 : vector<8x128xf32> to vector<1x8x128xf32>
    tpu.vector_store %arg3[%c0_14, %c0_15, %c0_16], %93 {strides = array<i32>} : memref<3x8x128xf32, #tpu.memory_space<vmem>>, vector<1x8x128xf32>,
    %c18 = arith.constant 18 : index
    %94 = memref.load %arg1[%c18] : memref<27xf32, #tpu.memory_space<smem>>
    %95 = vector.broadcast %94 : f32 to vector<8x128xf32>
    %96 = arith.mulf %30, %95 : vector<8x128xf32>
    %c19 = arith.constant 19 : index
    %97 = memref.load %arg1[%c19] : memref<27xf32, #tpu.memory_space<smem>>
    %98 = vector.broadcast %97 : f32 to vector<8x128xf32>
    %99 = arith.mulf %53, %98 : vector<8x128xf32>
    %100 = arith.addf %96, %99 : vector<8x128xf32>
    %c20 = arith.constant 20 : index
    %101 = memref.load %arg1[%c20] : memref<27xf32, #tpu.memory_space<smem>>
    %102 = vector.broadcast %101 : f32 to vector<8x128xf32>
    %103 = arith.mulf %76, %102 : vector<8x128xf32>
    %104 = arith.addf %100, %103 : vector<8x128xf32>
    %c25 = arith.constant 25 : index
    %105 = memref.load %arg1[%c25] : memref<27xf32, #tpu.memory_space<smem>>
    %106 = vector.broadcast %105 : f32 to vector<8x128xf32>
    %107 = arith.addf %104, %106 : vector<8x128xf32>
    %c1_17 = arith.constant 1 : index
    %c0_18 = arith.constant 0 : index
    %c0_19 = arith.constant 0 : index
    %108 = vector.load %arg3[%c1_17, %c0_18, %c0_19] : memref<3x8x128xf32, #tpu.memory_space<vmem>>, vector<1x8x128xf32>
    %109 = vector.shape_cast %108 : vector<1x8x128xf32> to vector<8x128xf32>
    %110 = vector.shape_cast %107 : vector<8x128xf32> to vector<1x8x128xf32>
    tpu.vector_store %arg3[%c1_17, %c0_18, %c0_19], %110 {strides = array<i32>} : memref<3x8x128xf32, #tpu.memory_space<vmem>>, vector<1x8x128xf32>,
    %c21 = arith.constant 21 : index
    %111 = memref.load %arg1[%c21] : memref<27xf32, #tpu.memory_space<smem>>
    %112 = vector.broadcast %111 : f32 to vector<8x128xf32>
    %113 = arith.mulf %30, %112 : vector<8x128xf32>
    %c22 = arith.constant 22 : index
    %114 = memref.load %arg1[%c22] : memref<27xf32, #tpu.memory_space<smem>>
    %115 = vector.broadcast %114 : f32 to vector<8x128xf32>
    %116 = arith.mulf %53, %115 : vector<8x128xf32>
    %117 = arith.addf %113, %116 : vector<8x128xf32>
    %c23 = arith.constant 23 : index
    %118 = memref.load %arg1[%c23] : memref<27xf32, #tpu.memory_space<smem>>
    %119 = vector.broadcast %118 : f32 to vector<8x128xf32>
    %120 = arith.mulf %76, %119 : vector<8x128xf32>
    %121 = arith.addf %117, %120 : vector<8x128xf32>
    %c26 = arith.constant 26 : index
    %122 = memref.load %arg1[%c26] : memref<27xf32, #tpu.memory_space<smem>>
    %123 = vector.broadcast %122 : f32 to vector<8x128xf32>
    %124 = arith.addf %121, %123 : vector<8x128xf32>
    %c2_20 = arith.constant 2 : index
    %c0_21 = arith.constant 0 : index
    %c0_22 = arith.constant 0 : index
    %125 = vector.load %arg3[%c2_20, %c0_21, %c0_22] : memref<3x8x128xf32, #tpu.memory_space<vmem>>, vector<1x8x128xf32>
    %126 = vector.shape_cast %125 : vector<1x8x128xf32> to vector<8x128xf32>
    %127 = vector.shape_cast %124 : vector<8x128xf32> to vector<1x8x128xf32>
    tpu.vector_store %arg3[%c2_20, %c0_21, %c0_22], %127 {strides = array<i32>} : memref<3x8x128xf32, #tpu.memory_space<vmem>>, vector<1x8x128xf32>,
    return
  }
  func.func @transform_0(%arg0: i32, %arg1: memref<27xf32, #tpu.memory_space<smem>>) -> (i32, i32, i32) {
    %c0_i32 = arith.constant 0 : i32
    %c0_i32_0 = arith.constant 0 : i32
    %c0_i32_1 = arith.constant 0 : i32
    return %c0_i32, %arg0, %c0_i32_0 : i32, i32, i32
  }
  func.func @transform_1(%arg0: i32, %arg1: memref<27xf32, #tpu.memory_space<smem>>) -> (i32, i32, i32) {
    %c0_i32 = arith.constant 0 : i32
    %c0_i32_0 = arith.constant 0 : i32
    %c0_i32_1 = arith.constant 0 : i32
    return %c0_i32, %arg0, %c0_i32_0 : i32, i32, i32
  }
}

</mosaic_0001>

<bundles_post_ra>
// kernel: tpu_custom_call.1
= control target key start
LH: loop header
LB: loop body
LE: loop exit
PB: predicated region body
PF: predicated region fallthrough
CT: control target
= control target key end

     0   :  { %s360_s0 = inlined_call_operand.hbm [shape: f32[27], index: 0, kind: input, shape index: {}]   ;;  %s361_s1 = inlined_call_operand.hbm [shape: f32[4,8,128], index: 1, kind: input, shape index: {}]   ;;  %s362_s2 = inlined_call_operand.hbm [shape: f32[3,8,128], index: 2, kind: output, shape index: {}]  }
   0x1   :  { %s217_s11 = scalar_lea.hbm %s360_s0, 16 }
   0x2   :  { %p218_p0 = scmp.ne.s32.totalorder %s360_s0, %s217_s11  ;;  %p221_p1 = scmp.lt.u32.totalorder %s217_s11, %s360_s0 }
   0x4   :  { %p223_p2 = pnand %p221_p1, %p218_p0 }
   0x6   :  { %226 = shalt.err (!%p223_p2)  }
   0x7   :  { %s277_s16 = smov [#allocation3]  }
   0x8   :  { %8 = dma.hbm_to_smem %s360_s0, 16, %s277_s16, [#allocation2] }
   0x9   :  { %271 = dma.done.wait [#allocation2], 16 }
   0xa   :  { %272 = vsyncadd [#allocation2], 4294967280 }
   0xb   :  { %10 = sfence }
   0xc   :  { %11 = vsyncpa [#allocation5], 0 }
   0xd   :  { %12 = vsyncpa [#allocation6], 0  ;;  %s278_s19 = smov [#allocation4]   ;;  %s227_s23 = scalar_lea.hbm %s361_s1, 512 }
   0xe   :  { %s18_s20 = sshll.u32 %s278_s19, 4  ;;  %p228_p3 = scmp.ne.s32.totalorder %s361_s1, %s227_s23  ;;  %s19_s20 = int_to_ptr.vmem [resolvable:$true] %s18_s20 }
   0xf   :  { %p231_p4 = scmp.lt.u32.totalorder %s227_s23, %s361_s1 }
  0x11   :  { %p233_p5 = pnand %p231_p4, %p228_p3 }
  0x13   :  { %236 = shalt.err (!%p233_p5)
}
  0x14   :  { %s237_s0 = scalar_lea.vmem %s19_s20, 512  ;;  %p242_p7 = scmp.lt.s32.totalorder %s19_s20, %s19_s20 }
  0x15   :  { %p238_p6 = scmp.ne.s32.totalorder %s19_s20, %s237_s0  ;;  %p243_p8 = scmp.lt.s32.totalorder %s237_s0, %s237_s0 }
  0x17   :  { %p244_p9 = por %p243_p8, %p242_p7 }
  0x19   :  { %p245_p10 = pnand %p244_p9, %p238_p6 }
  0x1b   :  { %248 = shalt.err (!%p245_p10)
}
  0x1c   :  { %s279_s28 = smov 128   ;;  %s280_s29 = smov 8  }
  0x1d   :  { %24 = dma.hbm_to_vmem [thread:$0]  %s361_s1, 512, %s19_s20, [#allocation5], %s279_s28, %s279_s28, %s280_s29  }
  0x1e   :  { %273 = dma.done.wait [#allocation5], 512  }
  0x1f   :  { %274 = vsyncadd [#allocation5], 4294966784  ;;  %s35_s4 = sld [smem:[#allocation3]]  ;;  %s171_s5 = sld [smem:[#allocation3 + $0x1]]  ;;  %v28_v0 = vld [vmem:[#allocation4] sm:$0xff]  ;;  %v30_v1 = vld [vmem:[#allocation4 + $0x8] sm:$0xff] }
  0x20   :  { %s172_s6 = sld [smem:[#allocation3 + $0x2]]  ;;  %s173_s7 = sld [smem:[#allocation3 + $0x3]]  ;;  %v32_v2 = vld [vmem:[#allocation4 + $0x10] sm:$0xff]  ;;  %v34_v5 = vld [vmem:[#allocation4 + $0x18] sm:$0xff] }
  0x21   :  { %s324_s8 = sld [smem:[#allocation3 + $0xc]]  ;;  %s177_s10 = sld [smem:[#allocation3 + $0x5]] }
  0x22   :  { %s176_s9 = sld [smem:[#allocation3 + $0x4]]  ;;  %s178_s11 = sld [smem:[#allocation3 + $0x6]] }
  0x23   :  { %s179_s12 = sld [smem:[#allocation3 + $0x7]]  ;;  %s326_s13 = sld [smem:[#allocation3 + $0x8]] }
  0x24   :  { %s328_s14 = sld [smem:[#allocation3 + $0x9]]  ;;  %s184_s1 = sld [smem:[#allocation3 + $0xa]] }
  0x25   :  { %v36_v3 = vstv %s35_s4  ;;  %v39_v4 = vstv %s171_s5  ;;  %s330_s15 = sld [smem:[#allocation3 + $0xd]]  ;;  %s185_s16 = sld [smem:[#allocation3 + $0xb]] }
  0x26   :  { %v37_v6 = vmul.f32 %v36_v3, %v28_v0  ;;  %v40_v7 = vmul.f32 %v39_v4, %v30_v1  ;;  %v43_v8 = vstv %s172_s6  ;;  %v47_v9 = vstv %s173_s7  ;;  %s186_s17 = sld [smem:[#allocation3 + $0xe]]  ;;  %s188_s18 = sld [smem:[#allocation3 + $0xf]] }
  0x27   :  { %v44_v10 = vmul.f32 %v43_v8, %v32_v2  ;;  %v48_v11 = vmul.f32 %v47_v9, %v34_v5  ;;  %v63_v15 = vstv %s177_s10  ;;  %v51_v17 = vstv %s324_s8  ;;  %s192_s19 = sld [smem:[#allocation3 + $0x12]]  ;;  %s189_s20 = sld [smem:[#allocation3 + $0x10]] }
  0x28   :  { %v60_v12 = vstv %s176_s9  ;;  %v41_v13 = vadd.f32 %v40_v7, %v37_v6  ;;  %v67_v16 = vstv %s178_s11  ;;  %v64_v18 = vmul.f32 %v63_v15, %v30_v1  ;;  %s196_s21 = sld [smem:[#allocation3 + $0x15]]  ;;  %s193_s22 = sld [smem:[#allocation3 + $0x13]] }
  0x29   :  { %v61_v14 = vmul.f32 %v60_v12, %v28_v0  ;;  %v68_v19 = vmul.f32 %v67_v16, %v32_v2  ;;  %v71_v20 = vstv %s179_s12  ;;  %v84_v23 = vstv %s326_s13  ;;  %s197_s23 = sld [smem:[#allocation3 + $0x16]]  ;;  %s190_s24 = sld [smem:[#allocation3 + $0x11]] }
  0x2a   :  { %v45_v21 = vadd.f32 %v44_v10, %v41_v13  ;;  %v72_v22 = vmul.f32 %v71_v20, %v34_v5  ;;  %v87_v24 = vstv %s328_s14  ;;  %v85_v26 = vmul.f32 %v84_v23, %v28_v0  ;;  %s194_s25 = sld [smem:[#allocation3 + $0x14]]  ;;  %s198_s26 = sld [smem:[#allocation3 + $0x17]] }
  0x2b   :  { %v65_v25 = vadd.f32 %v64_v18, %v61_v14  ;;  %v88_v27 = vmul.f32 %v87_v24, %v30_v1  ;;  %v91_v28 = vstv %s184_s1  ;;  %v95_v31 = vstv %s185_s16  ;;  %s336_s27 = sld [smem:[#allocation3 + $0x18]]  ;;  %s338_s0 = sld [smem:[#allocation3 + $0x19]] }
  0x2c   :  { %v49_v29 = vadd.f32 %v48_v11, %v45_v21  ;;  %v92_v30 = vmul.f32 %v91_v28, %v32_v2  ;;  %v96_v34 = vmul.f32 %v95_v31, %v34_v5  ;;  %v75_v36 = vstv %s330_s15  ;;  %s340_s30 = sld [smem:[#allocation3 + $0x1a]]  ;;  %s281_s3 = smov [#allocation7]  }
  0x2d   :  { %v69_v32 = vadd.f32 %v68_v19, %v65_v25  ;;  %v89_v33 = vadd.f32 %v88_v27, %v85_v26  ;;  %v99_v40 = vstv %s186_s17  ;;  %v108_v52 = vstv %s188_s18  ;;  %s159_s4 = sshll.u32 %s281_s3, 4  ;;  %s160_s4 = int_to_ptr.vmem [resolvable:$true] %s159_s4 }
  0x2e   :  { %v52_v35 = vadd.f32 %v51_v17, %v49_v29  ;;  %v123_v53 = vstv %s192_s19  ;;  %v139_v55 = vstv %s196_s21  ;;  %v111_v56 = vstv %s189_s20  ;;  %s249_s5 = scalar_lea.vmem %s160_s4, 384  ;;  %p254_p12 = scmp.lt.s32.totalorder %s160_s4, %s160_s4 }
  0x2f   :  { %v73_v37 = vadd.f32 %v72_v22, %v69_v32  ;;  %v93_v38 = vadd.f32 %v92_v30, %v89_v33  ;;  %v126_v57 = vstv %s193_s22  ;;  %v142_v58 = vstv %s197_s23  ;;  %p250_p11 = scmp.ne.s32.totalorder %s160_s4, %s249_s5  ;;  %p255_p13 = scmp.lt.s32.totalorder %s249_s5, %s249_s5 }
  0x30   :  { %v175_v39 = vmul.f32 -1.442695, %v52_v35  ;;  %v115_v62 = vstv %s190_s24  ;;  %v130_v63 = vstv %s194_s25  ;;  %v146_v4 = vstv %s198_s26 }
  0x31   :  { %v76_v41 = vadd.f32 %v75_v36, %v73_v37  ;;  %v97_v42 = vadd.f32 %v96_v34, %v93_v38  ;;  %v119_v10 = vstv %s336_s27  ;;  %v134_v11 = vstv %s338_s0  ;;  %p256_p0 = por %p255_p13, %p254_p12 }
  0x32   :  { %205 = vpow2.f32 %v175_v39  ;;  %v150_v16 = vstv %s340_s30 }
  0x33   :  { %v181_v43 = vmul.f32 -1.442695, %v76_v41  ;;  %v100_v44 = vadd.f32 %v99_v40, %v97_v42  ;;  %p257_p1 = pnand %p256_p0, %p250_p11 }
  0x35   :  { %207 = vpow2.f32 %v181_v43  ;;  %v187_v45 = vmul.f32 -1.442695, %v100_v44 }
  0x37   :  { %209 = vpow2.f32 %v187_v45 }
  0x3c   :  { %v206_v46 = vpop.eup %205 }
  0x3d   :  { %v56_v47 = vadd.f32 1.0, %v206_v46 }
  0x3f   :  { %v208_v48 = vpop.eup %207  ;;  %211 = vrcp.f32 %v56_v47 }
  0x40   :  { %v80_v49 = vadd.f32 1.0, %v208_v48 }
  0x41   :  { %v210_v50 = vpop.eup %209 }
  0x42   :  { %213 = vrcp.f32 %v80_v49  ;;  %v104_v51 = vadd.f32 1.0, %v210_v50 }
  0x44   :  { %215 = vrcp.f32 %v104_v51 }
  0x49   :  { %v212_v54 = vpop.eup %211 }
  0x4a   :  { %v109_v59 = vmul.f32 %v212_v54, %v108_v52  ;;  %v124_v60 = vmul.f32 %v212_v54, %v123_v53  ;;  %v140_v0 = vmul.f32 %v212_v54, %v139_v55 }
  0x4c   :  { %v214_v61 = vpop.eup %213 }
  0x4d   :  { %v112_v1 = vmul.f32 %v214_v61, %v111_v56  ;;  %v127_v2 = vmul.f32 %v214_v61, %v126_v57  ;;  %v143_v3 = vmul.f32 %v214_v61, %v142_v58 }
  0x4e   :  { %v216_v5 = vpop.eup %215 }
  0x4f   :  { %v113_v6 = vadd.f32 %v112_v1, %v109_v59  ;;  %v116_v7 = vmul.f32 %v216_v5, %v115_v62  ;;  %v128_v8 = vadd.f32 %v127_v2, %v124_v60  ;;  %v131_v9 = vmul.f32 %v216_v5, %v130_v63 }
  0x50   :  { %v144_v12 = vadd.f32 %v143_v3, %v140_v0  ;;  %v147_v13 = vmul.f32 %v216_v5, %v146_v4 }
  0x51   :  { %v117_v14 = vadd.f32 %v116_v7, %v113_v6  ;;  %v132_v15 = vadd.f32 %v131_v9, %v128_v8 }
  0x52   :  { %v148_v17 = vadd.f32 %v147_v13, %v144_v12 }
  0x53   :  { %v120_v18 = vadd.f32 %v119_v10, %v117_v14  ;;  %v135_v19 = vadd.f32 %v134_v11, %v132_v15 }
  0x54   :  { %v151_v20 = vadd.f32 %v150_v16, %v148_v17 }
  0x55   :  { %121 = vst [vmem:[#allocation7] sm:$0xff] %v120_v18  ;;  %137 = vst [vmem:[#allocation7 + $0x8] sm:$0xff] %v135_v19 }
  0x56   :  { %153 = vst [vmem:[#allocation7 + $0x10] sm:$0xff] %v151_v20 }
  0x57   :  { %260 = shalt.err (!%p257_p1)
}
  0x58   :  { %s261_s8 = scalar_lea.hbm %s362_s2, 384 }
  0x59   :  { %p262_p2 = scmp.ne.s32.totalorder %s362_s2, %s261_s8  ;;  %p265_p3 = scmp.lt.u32.totalorder %s261_s8, %s362_s2 }
  0x5b   :  { %p267_p4 = pnand %p265_p3, %p262_p2 }
  0x5d   :  { %270 = shalt.err (!%p267_p4)
}
  0x5e   :  { %165 = dma.vmem_to_hbm [thread:$0]  %s160_s4, 384, %s362_s2, [#allocation6], %s279_s28, %s279_s28, %s280_s29  }
  0x5f   :  { %275 = dma.done.wait [#allocation6], 384  }
  0x60   :  { %276 = vsyncadd [#allocation6], 4294966912 }
  0x61   :  { %169 = vsyncpa [#allocation5], 1 }
  0x62   :  { %170 = vsyncpa [#allocation6], 1 }

</bundles_post_ra>
